<compile_context>
chip_gen: v7x
topology: tpu7x:2x2x1
jax: 0.10.0
libtpu: 0.0.40
codegen_flags: <defaults>
</compile_context>

<pallas_src>
import functools

import numpy as np
import jax
import jax.numpy as jnp
from jax import lax
from jax.experimental import pallas as pl
from jax.experimental.pallas import tpu as pltpu

GELU_C = float(np.sqrt(2.0 / np.pi))            # gelu_new constant
_NT_DIMS = (((1,), (1,)), ((), ()))             # contract both last dims: A @ B.T, native layouts


def _round_up(x: int, m: int) -> int:
    return (x + m - 1) // m * m


def _make_mlp_kernel(act_fn: str):
    """Kernel factory: the activation choice is baked in statically (mirrors cfg['act_fn'])."""

    def mlp_kernel(x_ref, win_ref, bin_ref, wout_ref, bout_ref, o_ref, acc_ref):
        k = pl.program_id(1)                    # d_mlp (reduction) axis — innermost

        @pl.when(k == 0)
        def _():
            acc_ref[...] = jnp.zeros_like(acc_ref)

        # hook_pre: pre-activation for this d_mlp panel. W_in consumed in native
        # (d_mlp, d_model) layout; f32 accumulation on the MXU.
        pre = lax.dot_general(x_ref[...], win_ref[...], _NT_DIMS,
                              preferred_element_type=jnp.float32) + bin_ref[...]

        if act_fn == "gelu_new":
            pre3 = pre * pre * pre              # two VPU muls, no pow; f32 math (v5e-safe)
            post = 0.5 * pre * (1.0 + jnp.tanh(GELU_C * (pre + 0.044715 * pre3)))
        elif act_fn == "relu":
            post = jnp.maximum(pre, 0.0)
        else:
            raise ValueError(f"Invalid activation function name: {act_fn}")

        # hook_post identity. Partial second projection for this d_mlp panel, native
        # (d_model, d_mlp) W_out layout; cast back to the MXU operand dtype, accumulate in f32.
        acc_ref[...] += lax.dot_general(post.astype(wout_ref.dtype), wout_ref[...], _NT_DIMS,
                                        preferred_element_type=jnp.float32)

        @pl.when(k == pl.num_programs(1) - 1)
        def _():
            o_ref[...] = (acc_ref[...] + bout_ref[...]).astype(o_ref.dtype)

    return mlp_kernel


@functools.partial(jax.jit, static_argnames=("act_fn",))
def mlp_forward(x, W_in, b_in, W_out, b_out, *, act_fn="gelu_new"):
    """x: (B, S, D); W_in: (D_MLP, D); b_in: (D_MLP,); W_out: (D, D_MLP); b_out: (D,).

    MXU operands (x, W_in, W_out) run in x.dtype (pass bf16 for 2x MXU throughput);
    accumulation / GELU stay f32; output dtype == x.dtype.
    """
    B, S, D = x.shape
    D_MLP = W_in.shape[0]
    cdtype = x.dtype
    out_dtype = x.dtype
    rows = B * S

    # ---- static tile / padding plan -----------------------------------------------------------
    # Rows: large tiles amortize the ~0.35us/step overhead and feed the MXU rows; collapse to a
    # single step at tiny sizes. At real sizes the 'parallel' row axis has >=2 steps, which is
    # what shards work across v7x's two TensorCores.
    row_tile = 256 if rows >= 256 else _round_up(rows, 8)
    rows_p = _round_up(rows, row_tile)
    # d_model: pad to a multiple of 128 lanes -> unmasked (lane-dense) stores; exact (zero pad).
    Dp = _round_up(D, 128)
    # d_mlp: reduction grid axis so only one W_in/W_out panel is VMEM-resident per step.
    dmlp_tile = min(512, _round_up(D_MLP, 128))
    DMLPp = _round_up(D_MLP, dmlp_tile)

    # ---- operand prep (zero padding is exact for this MLP; no W.T in the per-call path) --------
    x2 = jnp.pad(x.reshape(rows, D).astype(cdtype), ((0, rows_p - rows), (0, Dp - D)))
    win = jnp.pad(W_in.astype(cdtype), ((0, DMLPp - D_MLP), (0, Dp - D)))     # native (d_mlp, d)
    wout = jnp.pad(W_out.astype(cdtype), ((0, Dp - D), (0, DMLPp - D_MLP)))   # native (d, d_mlp)
    bin_ = jnp.pad(b_in.astype(jnp.float32), (0, DMLPp - D_MLP)).reshape(1, DMLPp)
    bout = jnp.pad(b_out.astype(jnp.float32), (0, Dp - D)).reshape(1, Dp)

    grid = (rows_p // row_tile, DMLPp // dmlp_tile)

    # ---- VMEM budget: raise the scoped limit only when the tile plan actually needs it ---------
    isz = jnp.dtype(cdtype).itemsize
    est_bytes = (2 * (row_tile * Dp + dmlp_tile * Dp + Dp * dmlp_tile) * isz   # dbl-buffered inputs
                 + 2 * (dmlp_tile + Dp) * 4                                    # biases (f32)
                 + 2 * row_tile * Dp * jnp.dtype(out_dtype).itemsize           # output buffers
                 + row_tile * Dp * 4)                                          # f32 accumulator
    cp_kwargs = dict(dimension_semantics=("parallel", "arbitrary"))
    if est_bytes > 12 * 1024 * 1024:
        # TODO(synk): re-budget per generation (v5e 16/128 MiB, v6e 32/128, v7x 32/64 scoped/phys).
        cp_kwargs["vmem_limit_bytes"] = int(min(est_bytes * 1.5, 64 * 1024 * 1024))

    out_p = pl.pallas_call(
        _make_mlp_kernel(act_fn),
        out_shape=jax.ShapeDtypeStruct((rows_p, Dp), out_dtype),
        grid=grid,
        in_specs=[
            pl.BlockSpec((row_tile, Dp), lambda i, k: (i, 0)),     # x rows (resident across k)
            pl.BlockSpec((dmlp_tile, Dp), lambda i, k: (k, 0)),    # W_in panel, native layout
            pl.BlockSpec((1, dmlp_tile), lambda i, k: (0, k)),     # b_in panel (f32)
            pl.BlockSpec((Dp, dmlp_tile), lambda i, k: (0, k)),    # W_out panel, native layout
            pl.BlockSpec((1, Dp), lambda i, k: (0, 0)),            # b_out (grid-invariant, tiny)
        ],
        out_specs=pl.BlockSpec((row_tile, Dp), lambda i, k: (i, 0)),
        scratch_shapes=[pltpu.VMEM((row_tile, Dp), jnp.float32)],  # f32 accumulator
        compiler_params=pltpu.CompilerParams(**cp_kwargs),
    )(x2, win, bin_, wout, bout)

    return out_p[:rows, :D].reshape(B, S, D)


def reference_mlp(x, W_in, b_in, W_out, b_out, act_fn="gelu_new"):
    """Pure-JAX reference mirroring the PyTorch forward exactly."""
    pre = jnp.einsum("md,bpd->bpm", W_in, x) + b_in
    if act_fn == "gelu_new":
        post = 0.5 * pre * (1.0 + jnp.tanh(GELU_C * (pre + 0.044715 * pre ** 3)))
    elif act_fn == "relu":
        post = jax.nn.relu(pre)
    else:
        raise ValueError(act_fn)
    return jnp.einsum("dm,bpm->bpd", W_out, post) + b_out


if __name__ == "__main__":
    # Small shapes consistent with the module: batch=2, seq(pos)=8, d_model=32, d_mlp=128.
    B, S, D, D_MLP = 2, 8, 32, 128

    key = jax.random.PRNGKey(0)
    kx, k1, k2, k3, k4 = jax.random.split(key, 5)
    x = jax.random.normal(kx, (B, S, D), jnp.float32)
    W_in = 0.1 * jax.random.normal(k1, (D_MLP, D), jnp.float32)
    b_in = 0.1 * jax.random.normal(k2, (D_MLP,), jnp.float32)
    W_out = 0.1 * jax.random.normal(k3, (D, D_MLP), jnp.float32)
    b_out = 0.1 * jax.random.normal(k4, (D,), jnp.float32)

    # f32, gelu_new path (default cfg['act_fn'] == 'gelu_new')
    out = jax.block_until_ready(mlp_forward(x, W_in, b_in, W_out, b_out, act_fn="gelu_new"))
    ref = jax.block_until_ready(reference_mlp(x, W_in, b_in, W_out, b_out, act_fn="gelu_new"))
    np.testing.assert_allclose(np.asarray(out), np.asarray(ref), rtol=1e-4, atol=1e-4)

    # f32, relu path (other supported cfg['act_fn'])
    out_r = jax.block_until_ready(mlp_forward(x, W_in, b_in, W_out, b_out, act_fn="relu"))
    ref_r = jax.block_until_ready(reference_mlp(x, W_in, b_in, W_out, b_out, act_fn="relu"))
    np.testing.assert_allclose(np.asarray(out_r), np.asarray(ref_r), rtol=1e-4, atol=1e-4)

    # bf16 MXU operands (f32 accumulation + f32 GELU inside the kernel), compared against the
    # f32 reference evaluated on the bf16-rounded inputs.
    xb, Wib, Wob = (a.astype(jnp.bfloat16) for a in (x, W_in, W_out))
    out_b = jax.block_until_ready(mlp_forward(xb, Wib, b_in, Wob, b_out, act_fn="gelu_new"))
    ref_b = reference_mlp(xb.astype(jnp.float32), Wib.astype(jnp.float32), b_in,
                          Wob.astype(jnp.float32), b_out, act_fn="gelu_new")
    np.testing.assert_allclose(np.asarray(out_b, dtype=np.float32), np.asarray(ref_b),
                               rtol=2e-2, atol=2e-2)

    print("KERNEL_OK")
</pallas_src>

<mosaic_0001>
module attributes {stable_mosaic.version = 11 : i64} {
  func.func @mlp_kernel(%arg0: i32, %arg1: i32, %arg2: memref<16x128xf32, #tpu.memory_space<vmem>>, %arg3: memref<128x128xf32, #tpu.memory_space<vmem>>, %arg4: memref<1x128xf32, #tpu.memory_space<vmem>>, %arg5: memref<128x128xf32, #tpu.memory_space<vmem>>, %arg6: memref<1x128xf32, #tpu.memory_space<vmem>>, %arg7: memref<16x128xf32, #tpu.memory_space<vmem>>, %arg8: memref<16x128xf32, #tpu.memory_space<vmem>>) attributes {dimension_semantics = [#tpu.dimension_semantics<parallel>, #tpu.dimension_semantics<arbitrary>], iteration_bounds = array<i64: 1, 1>, scalar_prefetch = 0 : i64, scratch_operands = 1 : i64, tpu.core_type = #tpu.core_type<tc>, window_params = [{transform_indices = @transform_0, window_bounds = array<i64: 16, 128>}, {transform_indices = @transform_1, window_bounds = array<i64: 128, 128>}, {transform_indices = @transform_2, window_bounds = array<i64: 1, 128>}, {transform_indices = @transform_3, window_bounds = array<i64: 128, 128>}, {pipeline_mode = #tpu.pipeline_mode<synchronous>, transform_indices = @transform_4, window_bounds = array<i64: 1, 128>}, {transform_indices = @transform_5, window_bounds = array<i64: 16, 128>}]} {
    %c0_i32 = arith.constant 0 : i32
    %0 = arith.cmpi eq, %arg1, %c0_i32 : i32
    %1 = arith.extui %0 : i1 to i32
    %c0_i32_0 = arith.constant 0 : i32
    %2 = arith.cmpi ne, %1, %c0_i32_0 : i32
    scf.if %2 {
      %cst_19 = arith.constant 0.000000e+00 : f32
      %30 = vector.broadcast %cst_19 : f32 to vector<16x128xf32>
      %c0_20 = arith.constant 0 : index
      %c0_21 = arith.constant 0 : index
      %31 = vector.load %arg8[%c0_20, %c0_21] : memref<16x128xf32, #tpu.memory_space<vmem>>, vector<16x128xf32>
      tpu.vector_store %arg8[%c0_20, %c0_21], %30 {strides = array<i32>} : memref<16x128xf32, #tpu.memory_space<vmem>>, vector<16x128xf32>,
    } else {
    }
    %c0 = arith.constant 0 : index
    %c0_1 = arith.constant 0 : index
    %3 = vector.load %arg2[%c0, %c0_1] : memref<16x128xf32, #tpu.memory_space<vmem>>, vector<16x128xf32>
    %c0_2 = arith.constant 0 : index
    %c0_3 = arith.constant 0 : index
    %4 = vector.load %arg3[%c0_2, %c0_3] : memref<128x128xf32, #tpu.memory_space<vmem>>, vector<128x128xf32>
    %cst = arith.constant dense<0.000000e+00> : vector<16x128xf32>
    %5 = tpu.matmul %3, %4, %cst {dimension_numbers = #tpu.dot_dimension_numbers<[1], [1], [0], [0], [0, 0, 1, 0], [], []>} : vector<16x128xf32>, vector<128x128xf32>, vector<16x128xf32> -> vector<16x128xf32>
    %c0_4 = arith.constant 0 : index
    %c0_5 = arith.constant 0 : index
    %6 = vector.load %arg4[%c0_4, %c0_5] : memref<1x128xf32, #tpu.memory_space<vmem>>, vector<1x128xf32>
    %7 = vector.broadcast %6 : vector<1x128xf32> to vector<16x128xf32>
    %8 = arith.addf %5, %7 : vector<16x128xf32>
    %9 = arith.mulf %8, %8 : vector<16x128xf32>
    %10 = arith.mulf %9, %8 : vector<16x128xf32>
    %cst_6 = arith.constant 5.000000e-01 : f32
    %11 = vector.broadcast %cst_6 : f32 to vector<16x128xf32>
    %12 = arith.mulf %11, %8 : vector<16x128xf32>
    %cst_7 = arith.constant 4.471500e-02 : f32
    %13 = vector.broadcast %cst_7 : f32 to vector<16x128xf32>
    %14 = arith.mulf %13, %10 : vector<16x128xf32>
    %15 = arith.addf %8, %14 : vector<16x128xf32>
    %cst_8 = arith.constant 0.797884583 : f32
    %16 = vector.broadcast %cst_8 : f32 to vector<16x128xf32>
    %17 = arith.mulf %16, %15 : vector<16x128xf32>
    %18 = math.tanh %17 : vector<16x128xf32>
    %cst_9 = arith.constant 1.000000e+00 : f32
    %19 = vector.broadcast %cst_9 : f32 to vector<16x128xf32>
    %20 = arith.addf %19, %18 : vector<16x128xf32>
    %21 = arith.mulf %12, %20 : vector<16x128xf32>
    %c0_10 = arith.constant 0 : index
    %c0_11 = arith.constant 0 : index
    %22 = vector.load %arg8[%c0_10, %c0_11] : memref<16x128xf32, #tpu.memory_space<vmem>>, vector<16x128xf32>
    %c0_12 = arith.constant 0 : index
    %c0_13 = arith.constant 0 : index
    %23 = vector.load %arg5[%c0_12, %c0_13] : memref<128x128xf32, #tpu.memory_space<vmem>>, vector<128x128xf32>
    %cst_14 = arith.constant dense<0.000000e+00> : vector<16x128xf32>
    %24 = tpu.matmul %21, %23, %cst_14 {dimension_numbers = #tpu.dot_dimension_numbers<[1], [1], [0], [0], [0, 0, 1, 0], [], []>} : vector<16x128xf32>, vector<128x128xf32>, vector<16x128xf32> -> vector<16x128xf32>
    %25 = arith.addf %22, %24 : vector<16x128xf32>
    %c0_15 = arith.constant 0 : index
    %c0_16 = arith.constant 0 : index
    %26 = vector.load %arg8[%c0_15, %c0_16] : memref<16x128xf32, #tpu.memory_space<vmem>>, vector<16x128xf32>
    tpu.vector_store %arg8[%c0_15, %c0_16], %25 {strides = array<i32>} : memref<16x128xf32, #tpu.memory_space<vmem>>, vector<16x128xf32>,
    %c0_i32_17 = arith.constant 0 : i32
    %27 = arith.cmpi eq, %arg1, %c0_i32_17 : i32
    %28 = arith.extui %27 : i1 to i32
    %c0_i32_18 = arith.constant 0 : i32
    %29 = arith.cmpi ne, %28, %c0_i32_18 : i32
    scf.if %29 {
      %c0_19 = arith.constant 0 : index
      %c0_20 = arith.constant 0 : index
      %30 = vector.load %arg8[%c0_19, %c0_20] : memref<16x128xf32, #tpu.memory_space<vmem>>, vector<16x128xf32>
      %c0_21 = arith.constant 0 : index
      %c0_22 = arith.constant 0 : index
      %31 = vector.load %arg6[%c0_21, %c0_22] : memref<1x128xf32, #tpu.memory_space<vmem>>, vector<1x128xf32>
      %32 = vector.broadcast %31 : vector<1x128xf32> to vector<16x128xf32>
      %33 = arith.addf %30, %32 : vector<16x128xf32>
      %c0_23 = arith.constant 0 : index
      %c0_24 = arith.constant 0 : index
      %34 = vector.load %arg7[%c0_23, %c0_24] : memref<16x128xf32, #tpu.memory_space<vmem>>, vector<16x128xf32>
      tpu.vector_store %arg7[%c0_23, %c0_24], %33 {strides = array<i32>} : memref<16x128xf32, #tpu.memory_space<vmem>>, vector<16x128xf32>,
    } else {
    }
    return
  }
  func.func @transform_0(%arg0: i32, %arg1: i32) -> (i32, i32) {
    %c0_i32 = arith.constant 0 : i32
    %c0_i32_0 = arith.constant 0 : i32
    return %arg0, %c0_i32 : i32, i32
  }
  func.func @transform_1(%arg0: i32, %arg1: i32) -> (i32, i32) {
    %c0_i32 = arith.constant 0 : i32
    %c0_i32_0 = arith.constant 0 : i32
    return %arg1, %c0_i32 : i32, i32
  }
  func.func @transform_2(%arg0: i32, %arg1: i32) -> (i32, i32) {
    %c0_i32 = arith.constant 0 : i32
    %c0_i32_0 = arith.constant 0 : i32
    return %c0_i32, %arg1 : i32, i32
  }
  func.func @transform_3(%arg0: i32, %arg1: i32) -> (i32, i32) {
    %c0_i32 = arith.constant 0 : i32
    %c0_i32_0 = arith.constant 0 : i32
    return %c0_i32, %arg1 : i32, i32
  }
  func.func @transform_4(%arg0: i32, %arg1: i32) -> (i32, i32) {
    %c0_i32 = arith.constant 0 : i32
    %c0_i32_0 = arith.constant 0 : i32
    %c0_i32_1 = arith.constant 0 : i32
    return %c0_i32, %c0_i32_0 : i32, i32
  }
  func.func @transform_5(%arg0: i32, %arg1: i32) -> (i32, i32) {
    %c0_i32 = arith.constant 0 : i32
    %c0_i32_0 = arith.constant 0 : i32
    return %arg0, %c0_i32 : i32, i32
  }
}

</mosaic_0001>

<bundles_post_ra>
// kernel: mlp_forward.1
= control target key start
LH: loop header
LB: loop body
LE: loop exit
PB: predicated region body
PF: predicated region fallthrough
CT: control target
= control target key end

     0   :  { %s581_s1 = inlined_call_operand.vmem [shape: f32[128,128], index: 1, kind: input, shape index: {}]   ;;  %s582_s0 = inlined_call_operand.vmem [shape: f32[16,128], index: 0, kind: input, shape index: {}]   ;;  %s583_s3 = inlined_call_operand.vmem [shape: f32[128,128], index: 3, kind: input, shape index: {}]   ;;  %s584_s2 = inlined_call_operand.vmem [shape: f32[1,128], index: 2, kind: input, shape index: {}]   ;;  %s585_s4 = inlined_call_operand.vmem [shape: f32[1,128], index: 4, kind: input, shape index: {}]   ;;  %s586_s5 = inlined_call_operand.vmem [shape: f32[16,128], index: 5, kind: output, shape index: {}]  }
   0x1   :  { %v28_v0 = vld [vmem:[%s581_s1] sm:$0xff]  ;;  %v29_v1 = vld [vmem:[%s581_s1 + $0x8] sm:$0xff]  ;;  %v30_v2 = vld [vmem:[%s581_s1 + $0x10] sm:$0xff] }
   0x2   :  { %v369_v3 = vpack.c.bf16 %v29_v1, %v28_v0  ;;  %v31_v4 = vld [vmem:[%s581_s1 + $0x18] sm:$0xff]  ;;  %v32_v6 = vld [vmem:[%s581_s1 + $0x20] sm:$0xff]  ;;  %v33_v7 = vld [vmem:[%s581_s1 + $0x28] sm:$0xff] }
   0x3   :  { %v373_v5 = vpack.c.bf16 %v31_v4, %v30_v2  ;;  %v26_v8 = vld [vmem:[%s582_s0] sm:$0xff]  ;;  %v147_v10 = vld [vmem:[%s583_s3 + $0x8] sm:$0xff]  ;;  %v148_v11 = vld [vmem:[%s583_s3 + $0x10] sm:$0xff]  ;;  %v377_v15 = vpack.c.bf16 %v33_v7, %v32_v6 }
   0x4   :  { %370 = vmatprep.subr.bf16.mxu0 %v369_v3  ;;  %331 = vmatprep.mubr.f32.mxu0 %v26_v8  ;;  %v146_v9 = vld [vmem:[%s583_s3] sm:$0xff]  ;;  %v149_v13 = vld [vmem:[%s583_s3 + $0x18] sm:$0xff]  ;;  %v151_v17 = vld [vmem:[%s583_s3 + $0x28] sm:$0xff] }
   0x5   :  { %372 = vmatpush3.bf16.xpose.msra.mxu0 %v369_v3  ;;  %v401_v12 = vpack.c.bf16 %v147_v10, %v146_v9  ;;  %v405_v14 = vpack.c.bf16 %v149_v13, %v148_v11  ;;  %v150_v16 = vld [vmem:[%s583_s3 + $0x20] sm:$0xff]  ;;  %v34_v18 = vld [vmem:[%s581_s1 + $0x30] sm:$0xff]  ;;  %v35_v19 = vld [vmem:[%s581_s1 + $0x38] sm:$0xff] }
   0x6   :  { %374 = vmatprep.subr.bf16.mxu0 %v373_v5  ;;  %v409_v20 = vpack.c.bf16 %v151_v17, %v150_v16  ;;  %v381_v21 = vpack.c.bf16 %v35_v19, %v34_v18  ;;  %v152_v22 = vld [vmem:[%s583_s3 + $0x30] sm:$0xff]  ;;  %v153_v23 = vld [vmem:[%s583_s3 + $0x38] sm:$0xff]  ;;  %v36_v24 = vld [vmem:[%s581_s1 + $0x40] sm:$0xff] }
   0x7   :  { %402 = vmatprep.subr.bf16.mxu1 %v401_v12  ;;  %v37_v25 = vld [vmem:[%s581_s1 + $0x48] sm:$0xff]  ;;  %v413_v26 = vpack.c.bf16 %v153_v23, %v152_v22  ;;  %v154_v28 = vld [vmem:[%s583_s3 + $0x40] sm:$0xff]  ;;  %v38_v30 = vld [vmem:[%s581_s1 + $0x50] sm:$0xff] }
   0x8   :  { %404 = vmatpush3.bf16.xpose.msra.mxu1 %v401_v12  ;;  %v385_v27 = vpack.c.bf16 %v37_v25, %v36_v24  ;;  %v155_v29 = vld [vmem:[%s583_s3 + $0x48] sm:$0xff]  ;;  %v39_v31 = vld [vmem:[%s581_s1 + $0x58] sm:$0xff]  ;;  %v40_v34 = vld [vmem:[%s581_s1 + $0x60] sm:$0xff] }
   0x9   :  { %406 = vmatprep.subr.bf16.mxu1 %v405_v14  ;;  %v417_v32 = vpack.c.bf16 %v155_v29, %v154_v28  ;;  %v389_v33 = vpack.c.bf16 %v39_v31, %v38_v30  ;;  %v41_v35 = vld [vmem:[%s581_s1 + $0x68] sm:$0xff]  ;;  %v42_v37 = vld [vmem:[%s581_s1 + $0x70] sm:$0xff]  ;;  %v43_v38 = vld [vmem:[%s581_s1 + $0x78] sm:$0xff] }
   0xa   :  { %v393_v36 = vpack.c.bf16 %v41_v35, %v40_v34  ;;  %v397_v39 = vpack.c.bf16 %v43_v38, %v42_v37  ;;  %v27_v40 = vld [vmem:[%s582_s0 + $0x8] sm:$0xff]  ;;  %v156_v41 = vld [vmem:[%s583_s3 + $0x50] sm:$0xff]  ;;  %v157_v42 = vld [vmem:[%s583_s3 + $0x58] sm:$0xff] }
   0xb   :  { %v421_v43 = vpack.c.bf16 %v157_v42, %v156_v41  ;;  %v158_v44 = vld [vmem:[%s583_s3 + $0x60] sm:$0xff]  ;;  %v159_v45 = vld [vmem:[%s583_s3 + $0x68] sm:$0xff]  ;;  %v160_v46 = vld [vmem:[%s583_s3 + $0x70] sm:$0xff] }
   0xc   :  { %v425_v47 = vpack.c.bf16 %v159_v45, %v158_v44  ;;  %v161_v48 = vld [vmem:[%s583_s3 + $0x78] sm:$0xff]  ;;  %v261_v50 = vld [vmem:[%s584_s2] ss:$0 sm:$0xff] }
   0xd   :  { %376 = vmatpush3.bf16.xpose.msra.mxu0 %v373_v5  ;;  %v429_v49 = vpack.c.bf16 %v161_v48, %v160_v46  ;;  %v262_v9 = vld [vmem:[%s585_s4] ss:$0 sm:$0xff] }
   0xe   :  { %378 = vmatprep.subr.bf16.mxu0 %v377_v15 }
  0x10   :  { %408 = vmatpush3.bf16.xpose.msra.mxu1 %v405_v14 }
  0x11   :  { %410 = vmatprep.subr.bf16.mxu1 %v409_v20 }
  0x15   :  { %380 = vmatpush3.bf16.xpose.msra.mxu0 %v377_v15 }
  0x16   :  { %382 = vmatprep.subr.bf16.mxu0 %v381_v21 }
  0x18   :  { %412 = vmatpush3.bf16.xpose.msra.mxu1 %v409_v20 }
  0x19   :  { %414 = vmatprep.subr.bf16.mxu1 %v413_v26 }
  0x1d   :  { %384 = vmatpush3.bf16.xpose.msra.mxu0 %v381_v21 }
  0x1e   :  { %386 = vmatprep.subr.bf16.mxu0 %v385_v27 }
  0x20   :  { %416 = vmatpush3.bf16.xpose.msra.mxu1 %v413_v26 }
  0x21   :  { %418 = vmatprep.subr.bf16.mxu1 %v417_v32 }
  0x25   :  { %388 = vmatpush3.bf16.xpose.msra.mxu0 %v385_v27 }
  0x26   :  { %390 = vmatprep.subr.bf16.mxu0 %v389_v33 }
  0x28   :  { %420 = vmatpush3.bf16.xpose.msra.mxu1 %v417_v32 }
  0x29   :  { %422 = vmatprep.subr.bf16.mxu1 %v421_v43 }
  0x2d   :  { %392 = vmatpush3.bf16.xpose.msra.mxu0 %v389_v33 }
  0x2e   :  { %394 = vmatprep.subr.bf16.mxu0 %v393_v36 }
  0x30   :  { %424 = vmatpush3.bf16.xpose.msra.mxu1 %v421_v43 }
  0x31   :  { %426 = vmatprep.subr.bf16.mxu1 %v425_v47 }
  0x35   :  { %396 = vmatpush3.bf16.xpose.msra.mxu0 %v393_v36 }
  0x36   :  { %398 = vmatprep.subr.bf16.mxu0 %v397_v39 }
  0x38   :  { %428 = vmatpush3.bf16.xpose.msra.mxu1 %v425_v47 }
  0x39   :  { %430 = vmatprep.subr.bf16.mxu1 %v429_v49 }
  0x3d   :  { %400 = vmatpush3.bf16.xpose.msra.mxu0 %v397_v39 }
  0x40   :  { %432 = vmatpush3.bf16.xpose.msra.mxu1 %v429_v49 }
  0x44   :  { %332 = vmatmul.mubr.f32.vlgmr.msra.gmra.mrb[0].mxu0 %v27_v40 }
 0x117   :  { %v333_v51 = vpop.f32.mrb[0].mxu0 }
 0x118   :  { %v123_v52 = vadd.f32 %v333_v51, %v261_v50  ;;  %v117_v53 = vpop.f32.mrb[1].mxu0 }
 0x119   :  { %v118_v54 = vadd.f32 %v261_v50, %v117_v53 }
 0x11a   :  { %v127_v55 = vmul.f32 %v123_v52, %v123_v52  ;;  %v131_v6 = vmul.f32 0.5, %v123_v52 }
 0x11b   :  { %v126_v56 = vmul.f32 %v118_v54, %v118_v54  ;;  %v130_v4 = vmul.f32 0.5, %v118_v54 }
 0x11c   :  { %v129_v57 = vmul.f32 %v127_v55, %v123_v52 }
 0x11d   :  { %v128_v58 = vmul.f32 %v126_v56, %v118_v54 }
 0x11e   :  { %v133_v59 = vmul.f32 0.044715, %v129_v57 }
 0x11f   :  { %v132_v60 = vmul.f32 0.044715, %v128_v58 }
 0x120   :  { %v135_v61 = vadd.f32 %v133_v59, %v123_v52 }
 0x121   :  { %v134_v62 = vadd.f32 %v132_v60, %v118_v54 }
 0x122   :  { %v137_v63 = vmul.f32 0.7978846, %v135_v61 }
 0x123   :  { %v136_v0 = vmul.f32 0.7978846, %v134_v62 }
 0x124   :  { %433 = vtanh.f32 %v137_v63 }
 0x125   :  { %435 = vtanh.f32 %v136_v0 }
 0x12e   :  { %v434_v1 = vpop.eup %433 }
 0x12f   :  { %v436_v2 = vpop.eup %435  ;;  %v141_v3 = vadd.f32 1.0, %v434_v1 }
 0x130   :  { %v140_v5 = vadd.f32 1.0, %v436_v2 }
 0x131   :  { %v143_v8 = vmul.f32 %v141_v3, %v131_v6 }
 0x132   :  { %v142_v7 = vmul.f32 %v140_v5, %v130_v4 }
 0x134   :  { %366 = vmatprep.mubr.f32.mxu1 %v142_v7 }
 0x135   :  { %367 = vmatmul.mubr.f32.vlgmr.msra.gmra.mrb[0].mxu1 %v143_v8 }
 0x208   :  { %v368_v10 = vpop.f32.mrb[0].mxu1 }
 0x209   :  { %v254_v11 = vadd.f32 %v368_v10, %v262_v9  ;;  %v228_v12 = vpop.f32.mrb[1].mxu1 }
 0x20a   :  { %v253_v13 = vadd.f32 %v262_v9, %v228_v12 }
 0x20b   :  { %256 = vst [vmem:[%s586_s5 + $0x8] sm:$0xff] %v254_v11 }
 0x20c   :  { %255 = vst [vmem:[%s586_s5] sm:$0xff] %v253_v13 }

</bundles_post_ra>
